<compile_context>
chip_gen: v6e
topology: v6e:2x2x1
jax: 0.10.0
libtpu: 0.0.40
codegen_flags: <defaults>
</compile_context>

<pallas_src>
import jax
import jax.numpy as jnp
from jax.experimental import pallas as pl
from jax.experimental.pallas import tpu as pltpu

_LANES = 128                            # vreg lane width
_TARGET_TILE_BYTES = 4 * 1024 * 1024    # ~4 MiB per input tile (review: v6e/v7x sweet spot)
_MIN_GRID = 8                           # keep the DMA pipeline + both v7x TCs busy
_VMEM_LIMIT_BYTES = 32 * 1024 * 1024    # covers 4x double-buffered 4 MiB tiles; <= physical
                                        # VMEM on v5e/v6e (128 MiB) and v7x (64 MiB)


def _round_up(x: int, m: int) -> int:
    return ((x + m - 1) // m) * m


def _round_down(x: int, m: int) -> int:
    return max(m, (x // m) * m)


def _sublane(dtype) -> int:
    # Native sublane tile: 8 for 4-byte, 16 for 2-byte, 32 for 1-byte dtypes.
    return max(8, 32 // jnp.dtype(dtype).itemsize)


def _temp_scale_kernel(temp_ref, x_ref, o_ref):
    # temp_ref: SMEM (1, 1) fp32 scalar; x_ref / o_ref: VMEM (tile_rows, col_block) tile.
    # Hoisted scalar reciprocal -> one vector multiply per vreg (HBM-roofline bound).
    inv_t = (1.0 / temp_ref[0, 0]).astype(x_ref.dtype)
    o_ref[...] = x_ref[...] * inv_t


def _choose_col_block(cols: int, itemsize: int, sub: int) -> int:
    if cols % _LANES == 0:
        # Lane-aligned (e.g. large-vocab logits): may split columns so that even a
        # minimal sub-row tile stays within the per-tile byte budget.
        return min(cols, _round_down(_TARGET_TILE_BYTES // (sub * itemsize), _LANES))
    # Unaligned class counts (e.g. 111 intents): full extent is always a legal block dim.
    # TODO(synk): a huge *unaligned* last dim (> few MiB per 8 rows) would need a
    # flatten fallback; intent-logit class counts never get near that.
    return cols


def _choose_tile_rows(rows: int, col_block: int, itemsize: int, sub: int) -> int:
    bytes_per_row = max(1, col_block * itemsize)
    # Rows giving ~_TARGET_TILE_BYTES per tile.
    by_bytes = _round_down(max(sub, _TARGET_TILE_BYTES // bytes_per_row), sub)
    # Rows giving >= _MIN_GRID grid steps when there is enough work.
    by_grid = _round_up(max(1, pl.cdiv(rows, _MIN_GRID)), sub)
    tile_rows = max(sub, min(by_bytes, by_grid))
    # Never larger than the (sublane-rounded) array itself.
    return min(tile_rows, _round_up(rows, sub))


def temperature_scale(logits: jax.Array, temperature: jax.Array) -> jax.Array:
    """Pallas equivalent of ModelWithTeperature.temperature_scale: logits / temperature."""
    orig_shape = logits.shape
    dtype = logits.dtype

    if logits.size == 0:
        return logits
    if logits.ndim == 0:
        return (logits / temperature.reshape(()).astype(jnp.float32)).astype(dtype)

    # Merge leading dims; the minor (class) dim stays put => free reshape, no pad/slice.
    cols = orig_shape[-1]
    x2d = logits.reshape(-1, cols)
    rows = x2d.shape[0]

    itemsize = jnp.dtype(dtype).itemsize
    sub = _sublane(dtype)
    col_block = _choose_col_block(cols, itemsize, sub)
    tile_rows = _choose_tile_rows(rows, col_block, itemsize, sub)
    grid = (pl.cdiv(rows, tile_rows), pl.cdiv(cols, col_block))  # ragged blocks masked

    temp_smem = temperature.reshape(1, 1).astype(jnp.float32)

    n = rows * cols
    cost = pl.CostEstimate(flops=n, transcendentals=0,
                           bytes_accessed=2 * n * itemsize + 4)

    out2d = pl.pallas_call(
        _temp_scale_kernel,
        out_shape=jax.ShapeDtypeStruct((rows, cols), dtype),
        grid=grid,
        in_specs=[
            pl.BlockSpec(memory_space=pltpu.SMEM),                     # scalar temperature
            pl.BlockSpec((tile_rows, col_block), lambda i, j: (i, j)),  # logits tile
        ],
        out_specs=pl.BlockSpec((tile_rows, col_block), lambda i, j: (i, j)),
        compiler_params=pltpu.CompilerParams(
            dimension_semantics=("parallel", "parallel"),  # megacore-shardable
            vmem_limit_bytes=_VMEM_LIMIT_BYTES,
        ),
        cost_estimate=cost,
    )(temp_smem, x2d)

    return out2d.reshape(orig_shape)


class ModelWithTemperatureJAX:
    """Thin JAX equivalent of ModelWithTeperature (learner omitted — synthetic logits)."""

    def __init__(self):
        # nn.Parameter(torch.ones(1) * 1.5)
        self.temperature = jnp.ones((1,), dtype=jnp.float32) * 1.5

    def forward(self, logits: jax.Array) -> jax.Array:
        # TODO(synk): self.learner.process(text) (external DenverLearner) has no Pallas
        # equivalent; only the temperature scaling of its intent logits is ported.
        return temperature_scale(logits, self.temperature)


if __name__ == "__main__":
    model = ModelWithTemperatureJAX()

    # Primary small demo consistent with the module: batch of 8, 32 intent classes.
    B, C = 8, 32
    logits = jax.random.normal(jax.random.PRNGKey(0), (B, C), dtype=jnp.float32) * 3.0
    out = jax.block_until_ready(model.forward(logits))
    ref = logits / model.temperature[0]
    assert out.shape == (B, C) and out.dtype == logits.dtype
    assert jnp.allclose(out, ref, atol=1e-5, rtol=1e-5)

    # Secondary check: multi-step grid, unaligned class count (111 lanes, full-extent
    # block dim) and a masked ragged final row-block — no wrapper pad / slice at all.
    B2, C2 = 5000, 111
    logits2 = jax.random.normal(jax.random.PRNGKey(1), (B2, C2), dtype=jnp.float32)
    out2 = jax.block_until_ready(model.forward(logits2))
    ref2 = logits2 / model.temperature[0]
    assert out2.shape == (B2, C2) and out2.dtype == logits2.dtype
    assert jnp.allclose(out2, ref2, atol=1e-5, rtol=1e-5)

    print("KERNEL_OK")
</pallas_src>

<mosaic_0001>
module attributes {stable_mosaic.version = 11 : i64} {
  func.func @_temp_scale_kernel(%arg0: i32, %arg1: i32, %arg2: memref<1x1xf32, #tpu.memory_space<smem>>, %arg3: memref<8x32xf32, #tpu.memory_space<vmem>>, %arg4: memref<8x32xf32, #tpu.memory_space<vmem>>) attributes {dimension_semantics = [#tpu.dimension_semantics<parallel>, #tpu.dimension_semantics<parallel>], iteration_bounds = array<i64: 1, 1>, scalar_prefetch = 0 : i64, scratch_operands = 0 : i64, tpu.core_type = #tpu.core_type<tc>, window_params = [{transform_indices = @transform_0, window_bounds = array<i64: 1, 1>}, {transform_indices = @transform_1, window_bounds = array<i64: 8, 32>}, {transform_indices = @transform_2, window_bounds = array<i64: 8, 32>}]} {
    %c0 = arith.constant 0 : index
    %c0_0 = arith.constant 0 : index
    %0 = memref.load %arg2[%c0, %c0_0] : memref<1x1xf32, #tpu.memory_space<smem>>
    %cst = arith.constant 1.000000e+00 : f32
    %1 = arith.divf %cst, %0 : f32
    %c0_1 = arith.constant 0 : index
    %c0_2 = arith.constant 0 : index
    %2 = vector.load %arg3[%c0_1, %c0_2] : memref<8x32xf32, #tpu.memory_space<vmem>>, vector<8x32xf32>
    %3 = vector.broadcast %1 : f32 to vector<8x32xf32>
    %4 = arith.mulf %2, %3 : vector<8x32xf32>
    %c0_3 = arith.constant 0 : index
    %c0_4 = arith.constant 0 : index
    %5 = vector.load %arg4[%c0_3, %c0_4] : memref<8x32xf32, #tpu.memory_space<vmem>>, vector<8x32xf32>
    tpu.vector_store %arg4[%c0_3, %c0_4], %4 {strides = array<i32>} : memref<8x32xf32, #tpu.memory_space<vmem>>, vector<8x32xf32>,
    return
  }
  func.func @transform_0(%arg0: i32, %arg1: i32) -> (i32, i32) {
    %c0_i32 = arith.constant 0 : i32
    %c0_i32_0 = arith.constant 0 : i32
    %c0_i32_1 = arith.constant 0 : i32
    return %c0_i32, %c0_i32_0 : i32, i32
  }
  func.func @transform_1(%arg0: i32, %arg1: i32) -> (i32, i32) {
    %c0_i32 = arith.constant 0 : i32
    return %arg0, %arg1 : i32, i32
  }
  func.func @transform_2(%arg0: i32, %arg1: i32) -> (i32, i32) {
    %c0_i32 = arith.constant 0 : i32
    return %arg0, %arg1 : i32, i32
  }
}

</mosaic_0001>

<bundles_post_ra>
// kernel: tpu_custom_call.1
= control target key start
LH: loop header
LB: loop body
LE: loop exit
PB: predicated region body
PF: predicated region fallthrough
CT: control target
= control target key end

     0   :  { %8 = vsyncpa [#allocation4], 0  ;;  %s125_s0 = inlined_call_operand.<no memory space> [shape: f32[1,1], index: 0, kind: input, shape index: {}]   ;;  %s126_s1 = inlined_call_operand.hbm [shape: f32[8,32], index: 1, kind: input, shape index: {}]   ;;  %s127_s2 = inlined_call_operand.hbm [shape: f32[8,32], index: 2, kind: output, shape index: {}]  }
   0x1   :  { %9 = vsyncpa [#allocation5], 0  ;;  %s99_s9 = smov [#allocation3]  }
   0x2   :  { %s18_s10 = sshll.u32 %s99_s9, 4  ;;  %s19_s10 = int_to_ptr.vmem [resolvable:$true] %s18_s10 }
   0x3   :  { %s63_s11 = scalar_lea.vmem %s19_s10, 128  ;;  %p68_p1 = scmp.lt.s32.totalorder %s19_s10, %s19_s10 }
   0x4   :  { %p64_p0 = scmp.ne.s32.totalorder %s19_s10, %s63_s11  ;;  %p69_p2 = scmp.lt.s32.totalorder %s63_s11, %s63_s11 }
   0x6   :  { %p70_p3 = por %p69_p2, %p68_p1 }
   0x8   :  { %p71_p4 = pnand %p70_p3, %p64_p0 }
   0xa   :  { %74 = shalt.err (!%p71_p4)
}
   0xb   :  { %21 = dma.hbm_to_vmem [thread:$0]  %s126_s1, 128, %s19_s10, [#allocation4]   ;;  %v26_v0 = vstv %s125_s0 }
   0xc   :  { %95 = dma.done.wait [#allocation4], 128  }
   0xd   :  { %96 = vsyncadd [#allocation4], 4294967168  ;;  %53 = vrcp.f32 %v26_v0  ;;  %v29_v2 = vld [vmem:[#allocation3] sm:$0xff]  ;;  %s100_s16 = smov [#allocation6]   ;;  %vm32_vm0 = vcmask 261120  }
   0xe   :  { %s40_s17 = sshll.u32 %s100_s16, 4  ;;  %s41_s17 = int_to_ptr.vmem [resolvable:$true] %s40_s17 }
   0xf   :  { %s75_s19 = scalar_lea.vmem %s41_s17, 128  ;;  %p80_p6 = scmp.lt.s32.totalorder %s41_s17, %s41_s17 }
  0x10   :  { %p76_p5 = scmp.ne.s32.totalorder %s41_s17, %s75_s19  ;;  %p81_p7 = scmp.lt.s32.totalorder %s75_s19, %s75_s19 }
  0x12   :  { %p82_p8 = por %p81_p7, %p80_p6 }
  0x14   :  { %p83_p9 = pnand %p82_p8, %p76_p5 }
  0x1a   :  { %v54_v1 = vpop.eup %53 }
  0x1b   :  { %49 = vpush %v54_v1 }
  0x4c   :  { %s50_s18 = spop %49 }
  0x4d   :  { %v30_v3 = vstv %s50_s18 }
  0x4e   :  { %v31_v4 = vmul.f32 %v30_v3, %v29_v2 }
  0x50   :  { %33 = vst.msk [vmem:[#allocation6] sm:$0xff] %vm32_vm0, %v31_v4 }
  0x51   :  { %86 = shalt.err (!%p83_p9)
}
  0x52   :  { %43 = dma.vmem_to_hbm [thread:$0]  %s41_s17, 128, %s127_s2, [#allocation5]  }
  0x53   :  { %97 = dma.done.wait [#allocation5], 128  }
  0x54   :  { %98 = vsyncadd [#allocation5], 4294967168 }
  0x55   :  { %47 = vsyncpa [#allocation4], 1 }
  0x56   :  { %48 = vsyncpa [#allocation5], 1 }

</bundles_post_ra>
